<compile_context>
chip_gen: v5e
topology: v5e:2x2
jax: 0.10.0
libtpu: 0.0.40
codegen_flags: <defaults>
</compile_context>

<pallas_src>
import jax
import jax.numpy as jnp
from jax import lax
from jax.experimental import pallas as pl
from jax.experimental.pallas import tpu as pltpu

MEL_LAMBDA = 45.0              # matches nn.Module default mel_lambda=45
LANES = 128                    # vreg lane width
SUBLANES = 8                   # vreg sublane depth (f32)
ROW_FOLD = 256                 # rows folded per unrolled sub-block (~32 f32 vregs)
TARGET_BLOCK_BYTES = 8 << 20   # ~8 MiB per input block per grid step
CT_MAX = 8192                  # cap on the lane-tile (column / reduction axis)


def _pick_tiles(rows, cols, itemsize, target_bytes):
    """Pick (RT, CT): lane-dense, grown along the column (reduction) axis,
    row tile capped at ~ceil(rows/2) so GR >= 2 when possible (v7x megacore)."""
    if itemsize >= 4:
        smult = SUBLANES
    elif itemsize == 2:
        smult = 16              # native bf16 (16,128) tiling
    else:
        smult = 32              # int8 / fp8

    # Column (lane) tile: multiple of 128, or full extent if cols < 128.
    if cols >= LANES:
        ct = min(CT_MAX, (cols // LANES) * LANES)
    else:
        ct = cols

    # Row (sublane) tile.
    target_elems = max(target_bytes // itemsize, smult * max(ct, 1))
    if rows >= smult:
        rt_cap = (rows // smult) * smult
        half = -(-rows // 2)                       # ceil(rows / 2)
        half = -(-half // smult) * smult           # round up to sublane multiple
        budget = max(smult, (target_elems // max(ct, 1)) // smult * smult)
        rt = max(smult, min(rt_cap, half, budget))
    else:
        rt = rows                                   # tiny: full-extent block (legal)
    return rt, ct


def mel_spectrogram_loss(pred_melspec, true_melspec, mel_lambda=MEL_LAMBDA):
    """mel_lambda * mean(|pred - true|), computed with a Pallas reduction kernel."""
    assert pred_melspec.shape == true_melspec.shape
    n_elems = int(pred_melspec.size)

    # Free (bitcast) 2-D view: collapse leading dims, keep last dim as lanes.
    if pred_melspec.ndim >= 2:
        T = int(pred_melspec.shape[-1])
        R = n_elems // T
    else:
        T = max(n_elems, 1)
        R = 1
    p2 = pred_melspec.reshape(R, T)
    t2 = true_melspec.reshape(R, T)

    itemsize = jnp.dtype(pred_melspec.dtype).itemsize
    RT, CT = _pick_tiles(R, T, itemsize, TARGET_BLOCK_BYTES)
    GR = -(-R // RT)                        # ceil-div
    GC = -(-T // CT)
    need_row_mask = (R % RT) != 0
    need_col_mask = (T % CT) != 0

    # Per-row-chunk partial accumulator: one (8,128)-ish vreg on the main path.
    ACC_C = LANES if (CT >= LANES and CT % LANES == 0) else CT
    ACC_R = SUBLANES if (RT >= SUBLANES and RT % SUBLANES == 0) else RT
    n_lane_groups = CT // ACC_C

    def kernel(p_ref, t_ref, o_ref):
        i = pl.program_id(0)                # row chunk  ("parallel")
        j = pl.program_id(1)                # col chunk  ("arbitrary" / reduction)

        @pl.when(j == 0)
        def _():
            o_ref[...] = jnp.zeros_like(o_ref)

        def accumulate(masked):
            acc = jnp.zeros((ACC_R, ACC_C), jnp.float32)
            for g in range(n_lane_groups):
                c0 = g * ACC_C
                col_mask = None
                if masked and need_col_mask:
                    col_mask = (j * CT + c0
                                + lax.broadcasted_iota(jnp.int32, (1, ACC_C), 1)) < T
                for r0 in range(0, RT, ROW_FOLD):
                    nr = min(ROW_FOLD, RT - r0)
                    ps = p_ref[r0:r0 + nr, c0:c0 + ACC_C].astype(jnp.float32)
                    ts = t_ref[r0:r0 + nr, c0:c0 + ACC_C].astype(jnp.float32)
                    blk = jnp.abs(ps - ts)
                    # Mask AFTER abs so OOB garbage (possibly NaN) never
                    # reaches the accumulator.
                    if masked and need_row_mask:
                        rm = (i * RT + r0
                              + lax.broadcasted_iota(jnp.int32, (nr, 1), 0)) < R
                        blk = jnp.where(rm, blk, 0.0)
                    if col_mask is not None:
                        blk = jnp.where(col_mask, blk, 0.0)
                    # Fold rows to 8 sublanes with pure VPU adds (no XLU).
                    if nr > SUBLANES and nr % SUBLANES == 0:
                        blk = blk.reshape(nr // SUBLANES, SUBLANES, ACC_C).sum(axis=0)
                    acc = acc + blk
            o_ref[...] += acc

        if need_row_mask or need_col_mask:
            edge = None
            if need_row_mask:
                edge = (i == GR - 1)
            if need_col_mask:
                c_edge = (j == GC - 1)
                edge = c_edge if edge is None else (edge | c_edge)

            @pl.when(jnp.logical_not(edge))
            def _():
                accumulate(False)           # fast unmasked path: interior tiles

            @pl.when(edge)
            def _():
                accumulate(True)            # masked path: ragged edge tiles only
        else:
            accumulate(False)

    # VMEM budget: 2 inputs x 2 pipeline buffers x tile + output blocks + headroom.
    in_tile_bytes = RT * CT * itemsize
    out_tile_bytes = ACC_R * ACC_C * 4
    vmem_need = 4 * in_tile_bytes + 2 * out_tile_bytes + (4 << 20)
    vmem_limit = int(min(max(vmem_need, 32 << 20), 56 << 20))  # fits v7x's 64 MiB/TC

    partials = pl.pallas_call(
        kernel,
        out_shape=jax.ShapeDtypeStruct((GR, ACC_R, ACC_C), jnp.float32),
        grid_spec=pltpu.PrefetchScalarGridSpec(
            num_scalar_prefetch=0,
            grid=(GR, GC),
            in_specs=[
                pl.BlockSpec((RT, CT), lambda i, j: (i, j)),
                pl.BlockSpec((RT, CT), lambda i, j: (i, j)),
            ],
            out_specs=pl.BlockSpec((None, ACC_R, ACC_C),
                                   lambda i, j: (i, 0, 0)),
        ),
        compiler_params=pltpu.CompilerParams(
            dimension_semantics=("parallel", "arbitrary"),
            vmem_limit_bytes=vmem_limit),
        cost_estimate=pl.CostEstimate(
            flops=3 * n_elems,
            transcendentals=0,
            bytes_accessed=2 * n_elems * itemsize + GR * ACC_R * ACC_C * 4),
    )(p2, t2)

    total_abs = jnp.sum(partials, dtype=jnp.float32)
    # Mean over the ORIGINAL element count; always return float32.
    return jnp.float32(mel_lambda) * total_abs / jnp.float32(n_elems)


if __name__ == "__main__":
    key = jax.random.PRNGKey(0)
    k1, k2, k3, k4 = jax.random.split(key, 4)

    # Module-consistent small shapes: batch=2, n_mels=80, frames=100.
    shape = (2, 80, 100)
    pred = jax.random.normal(k1, shape, dtype=jnp.float32)
    true = jax.random.normal(k2, shape, dtype=jnp.float32)
    loss = jax.block_until_ready(mel_spectrogram_loss(pred, true))
    ref = MEL_LAMBDA * jnp.mean(jnp.abs(pred - true))
    assert jnp.allclose(loss, ref, rtol=1e-4, atol=1e-5), (loss, ref)

    # Shape exercising ragged row/col tails, multiple 128-lane groups, and the
    # masked-edge / unmasked-interior pl.when split.
    shape2 = (3, 50, 300)
    pred2 = jax.random.normal(k3, shape2, dtype=jnp.float32)
    true2 = jax.random.normal(k4, shape2, dtype=jnp.float32)
    loss2 = jax.block_until_ready(mel_spectrogram_loss(pred2, true2))
    ref2 = MEL_LAMBDA * jnp.mean(jnp.abs(pred2 - true2))
    assert jnp.allclose(loss2, ref2, rtol=1e-4, atol=1e-5), (loss2, ref2)

    print("KERNEL_OK")
</pallas_src>

<mosaic_0001>
module attributes {stable_mosaic.version = 11 : i64} {
  func.func @kernel(%arg0: i32, %arg1: i32, %arg2: memref<80x100xf32, #tpu.memory_space<vmem>>, %arg3: memref<80x100xf32, #tpu.memory_space<vmem>>, %arg4: memref<1x8x100xf32, #tpu.memory_space<vmem>>) attributes {dimension_semantics = [#tpu.dimension_semantics<parallel>, #tpu.dimension_semantics<arbitrary>], iteration_bounds = array<i64: 2, 1>, scalar_prefetch = 0 : i64, scratch_operands = 0 : i64, tpu.core_type = #tpu.core_type<tc>, window_params = [{transform_indices = @transform_0, window_bounds = array<i64: 80, 100>}, {transform_indices = @transform_1, window_bounds = array<i64: 80, 100>}, {transform_indices = @transform_2, window_bounds = array<i64: 1, 8, 100>}]} {
    %c0_i32 = arith.constant 0 : i32
    %0 = arith.cmpi eq, %arg1, %c0_i32 : i32
    %1 = arith.extui %0 : i1 to i32
    %c0_i32_0 = arith.constant 0 : i32
    %2 = arith.cmpi ne, %1, %c0_i32_0 : i32
    scf.if %2 {
      %cst_11 = arith.constant 0.000000e+00 : f32
      %17 = vector.broadcast %cst_11 : f32 to vector<8x100xf32>
      %c0_12 = arith.constant 0 : index
      %c0_13 = arith.constant 0 : index
      %c0_14 = arith.constant 0 : index
      %18 = vector.load %arg4[%c0_12, %c0_13, %c0_14] : memref<1x8x100xf32, #tpu.memory_space<vmem>>, vector<1x8x100xf32>
      %19 = vector.shape_cast %18 : vector<1x8x100xf32> to vector<8x100xf32>
      %20 = vector.shape_cast %17 : vector<8x100xf32> to vector<1x8x100xf32>
      tpu.vector_store %arg4[%c0_12, %c0_13, %c0_14], %20 {strides = array<i32>} : memref<1x8x100xf32, #tpu.memory_space<vmem>>, vector<1x8x100xf32>,
    } else {
    }
    %cst = arith.constant 0.000000e+00 : f32
    %3 = vector.broadcast %cst : f32 to vector<8x100xf32>
    %c0 = arith.constant 0 : index
    %c0_1 = arith.constant 0 : index
    %4 = vector.load %arg2[%c0, %c0_1] : memref<80x100xf32, #tpu.memory_space<vmem>>, vector<80x100xf32>
    %c0_2 = arith.constant 0 : index
    %c0_3 = arith.constant 0 : index
    %5 = vector.load %arg3[%c0_2, %c0_3] : memref<80x100xf32, #tpu.memory_space<vmem>>, vector<80x100xf32>
    %6 = arith.subf %4, %5 : vector<80x100xf32>
    %7 = math.absf %6 : vector<80x100xf32>
    %8 = vector.shape_cast %7 : vector<80x100xf32> to vector<10x8x100xf32>
    %cst_4 = arith.constant dense<0.000000e+00> : vector<8x100xf32>
    %9 = vector.multi_reduction <add>, %8, %cst_4 [0] : vector<10x8x100xf32> to vector<8x100xf32>
    %10 = arith.addf %3, %9 : vector<8x100xf32>
    %c0_5 = arith.constant 0 : index
    %c0_6 = arith.constant 0 : index
    %c0_7 = arith.constant 0 : index
    %11 = vector.load %arg4[%c0_5, %c0_6, %c0_7] : memref<1x8x100xf32, #tpu.memory_space<vmem>>, vector<1x8x100xf32>
    %12 = vector.shape_cast %11 : vector<1x8x100xf32> to vector<8x100xf32>
    %13 = arith.addf %12, %10 : vector<8x100xf32>
    %c0_8 = arith.constant 0 : index
    %c0_9 = arith.constant 0 : index
    %c0_10 = arith.constant 0 : index
    %14 = vector.load %arg4[%c0_8, %c0_9, %c0_10] : memref<1x8x100xf32, #tpu.memory_space<vmem>>, vector<1x8x100xf32>
    %15 = vector.shape_cast %14 : vector<1x8x100xf32> to vector<8x100xf32>
    %16 = vector.shape_cast %13 : vector<8x100xf32> to vector<1x8x100xf32>
    tpu.vector_store %arg4[%c0_8, %c0_9, %c0_10], %16 {strides = array<i32>} : memref<1x8x100xf32, #tpu.memory_space<vmem>>, vector<1x8x100xf32>,
    return
  }
  func.func @transform_0(%arg0: i32, %arg1: i32) -> (i32, i32) {
    %c0_i32 = arith.constant 0 : i32
    return %arg0, %arg1 : i32, i32
  }
  func.func @transform_1(%arg0: i32, %arg1: i32) -> (i32, i32) {
    %c0_i32 = arith.constant 0 : i32
    return %arg0, %arg1 : i32, i32
  }
  func.func @transform_2(%arg0: i32, %arg1: i32) -> (i32, i32, i32) {
    %c0_i32 = arith.constant 0 : i32
    %c0_i32_0 = arith.constant 0 : i32
    %c0_i32_1 = arith.constant 0 : i32
    return %arg0, %c0_i32, %c0_i32_0 : i32, i32, i32
  }
}

</mosaic_0001>

<bundles_post_ra>
// kernel: tpu_custom_call.1
= control target key start
LH: loop header
LB: loop body
LE: loop exit
PB: predicated region body
PF: predicated region fallthrough
CT: control target
= control target key end

     0   :  { %7 = vsyncpa [#allocation3], 0  ;;  %s854_s0 = inlined_call_operand.hbm [shape: f32[160,100], index: 0, kind: input, shape index: {}]   ;;  %s855_s1 = inlined_call_operand.hbm [shape: f32[160,100], index: 1, kind: input, shape index: {}]   ;;  %s856_s2 = inlined_call_operand.hbm [shape: f32[2,8,100], index: 2, kind: output, shape index: {}]  }
   0x1   :  { %9 = vsyncpa [#allocation3 + $0x1], 0 }
   0x2   :  { %10 = vsyncpa [#allocation6], 0 }
   0x3   :  { %12 = vsyncpa [#allocation6 + $0x1], 0 }
   0x4   :  { %13 = vsyncpa [#allocation4], 0 }
   0x5   :  { %15 = vsyncpa [#allocation4 + $0x1], 0  ;;  %s670_s9 = smov 0   ;;  %s672_s10 = smov 0  }
   0x6   :  { %s674_s11 = smov 0   ;;  %s676_s12 = smov 0  }
   0x7   :  { %s678_s13 = smov 0   ;;  %s680_s14 = smov 0  }
   0x8 LB: > { %s417_s15 = sadd.s32 4294967295, %s650_s14   ;;  %s418_s16 = sadd.s32 4294967294, %s650_s14   ;;  %s650_s14 = sphi %s680_s14, %s21_s14   ;;  %s646_s13 = sphi %s678_s13, %s866_s13   ;;  %s642_s12 = sphi %s676_s12, %s865_s12   ;;  %s638_s11 = sphi %s674_s11, %s864_s11   ;;  %s634_s10 = sphi %s672_s10, %s863_s10   ;;  %s630_s9 = sphi %s670_s9, %s862_s9  }
   0x9   : > { %s33_s17 = sadd.s32 1, %s646_s13  ;;  %s42_s18 = sadd.s32 1, %s638_s11 }
   0xa   : > { %p35_p0 = scmp.ge.s32.totalorder %s33_s17, 2  ;;  %p49_p1 = scmp.ne.s32.totalorder %s638_s11, %s634_s10 }
   0xb   : > { %p50_p2 = scmp.eq.s32.totalorder %s650_s14, 0  ;;  %p55_p3 = scmp.ne.s32.totalorder %s634_s10, %s630_s9 }
   0xc   : > { %s868_s17 = smov (%p35_p0, %s33_s17), 0  ;;  %p56_p5 = scmp.eq.s32.totalorder %s417_s15, 0 }
   0xd   : > { %p711_p4 = por %p50_p2, %p49_p1  ;;  %s37_s20 = ssub.s32 %s646_s13, %s868_s17 }
   0xe   : > { %p107_p6 = scmp.eq.s32.totalorder %s417_s15, 1  ;;  %p40_p7 = scmp.eq.s32.totalorder %s37_s20, 0 }
   0xf   : > { %p717_p8 = por %p56_p5, %p55_p3  ;;  %p113_p10 = scmp.eq.s32.totalorder %s418_s16, 1 }
  0x10   : > { %p721_p9 = por %p107_p6, %p49_p1  ;;  %p420_p12 = scmp.ge.s32.totalorder %s650_s14, 2 }
  0x11   : > { %s726_s23 = scalar_select %p40_p7, %s638_s11, %s42_s18  }
  0x12   : > { %p728_p11 = por %p113_p10, %p55_p3  ;;  %p451_p13 = scmp.lt.s32.totalorder %s650_s14, 2 }
  0x13   : > { %s735_s25 = sand.u32 1, %s638_s11   ;;  %s429_s27 = smul.u32 80, %s646_s13 }
  0x14   : > { %s431_s26 = smul.u32 80, %s735_s25  ;;  %p741_p0 = pnand %p451_p13, %p711_p4 }
  0x15   : > { %s143_s3 = scalar_lea.hbm %s854_s0, %s429_s27  ;;  %p423_p1 = scmp.ge.s32.totalorder %s650_s14, 1 }
  0x16   : > { %s137_s4 = scalar_lea.vmem [#allocation2], %s431_s26  ;;  %s144_s6 = sshll.u32 %s143_s3, 4  ;;  %s145_s6 = int_to_ptr.hbm [resolvable:$true] %s144_s6 }
  0x17   : > { %s146_s5 = sshll.u32 %s137_s4, 4  ;;  %s134_s7 = scalar_lea.sflag [#allocation3], %s735_s25  ;;  %s147_s5 = int_to_ptr.vmem [resolvable:$true] %s146_s5 }
  0x18   : > { %s652_s8 = smov 128   ;;  %s653_s15 = smov 8  }
  0x19   : > { %443 = dma.hbm_to_vmem [thread:$0]  (!%p741_p0), %s145_s6, 1280, %s147_s5, %s134_s7, %s652_s8, %s652_s8, %s653_s15  }
  0x1a   : > { %p177_p2 = scmp.lt.s32.totalorder %s650_s14, 3  ;;  %s166_s19 = scalar_lea.hbm %s855_s1, %s429_s27 }
  0x1b   : > { %s167_s20 = sshll.u32 %s166_s19, 4  ;;  %s160_s29 = scalar_lea.vmem [#allocation5], %s431_s26  ;;  %s168_s20 = int_to_ptr.hbm [resolvable:$true] %s167_s20 }
  0x1c   : > { %p178_p3 = pnand %p423_p1, %p177_p2  ;;  %s169_s30 = sshll.u32 %s160_s29, 4  ;;  %s170_s30 = int_to_ptr.vmem [resolvable:$true] %s169_s30 }
  0x1d   : > { %s157_s3 = scalar_lea.sflag [#allocation6], %s735_s25  ;;  %s760_s4 = sand.u32 (!%p178_p3), 1, %s634_s10  }
  0x1e   : > { %446 = dma.hbm_to_vmem [thread:$0]  (!%p741_p0), %s168_s20, 1280, %s170_s30, %s157_s3, %s652_s8, %s652_s8, %s653_s15  }
  0x1f   : > { %181 = sbr.rel (%p178_p3) target bundleno = 70 (0x46), region = 28  ;;  %s184_s6 = scalar_lea.sflag (!%p178_p3), [#allocation3], %s760_s4 }
  0x20   : > { %s433_s5 = smul.u32 (!%p178_p3), 80, %s760_s4 }
  0x22   : > { %s764_s7 = scalar_lea.vmem (!%p178_p3), [#allocation2], %s433_s5 }
  0x24   : > { %617 = dma.done.wait (%p717_p8), %s184_s6, 1280  }
  0x25   : > { %619 = vsyncadd (%p717_p8), %s184_s6, 4294966016  ;;  %s194_s25 = scalar_lea.sflag [#allocation6], %s760_s4  ;;  %s771_s26 = scalar_lea.vmem [#allocation5], %s433_s5 }
  0x26   : > { %621 = dma.done.wait (%p717_p8), %s194_s25, 1280  }
  0x27   : > { %623 = vsyncadd (%p717_p8), %s194_s25, 4294966016  ;;  %s424_s27 = sshll.u32 %s760_s4, 3  ;;  %vm230_vm0 = vcmask 818176   ;;  %v654_v0 = vmov 0.0   ;;  %v232_v1 = vld [vmem:[%s764_s7] sm:$0xff]  ;;  %v233_v2 = vld [vmem:[%s764_s7 + $0x8] sm:$0xff] }
  0x28   : > { %s778_s28 = scalar_lea.vmem [#allocation7], %s424_s27  ;;  %v234_v3 = vld [vmem:[%s764_s7 + $0x10] sm:$0xff]  ;;  %v235_v4 = vld [vmem:[%s764_s7 + $0x18] sm:$0xff]  ;;  %v236_v5 = vld [vmem:[%s764_s7 + $0x20] sm:$0xff]  ;;  %s426_s21 = sshll.u32 %s642_s12, 3 }
  0x29   : > { %231 = vst.msk [vmem:[%s778_s28] sm:$0xff] %vm230_vm0, %v654_v0  ;;  %v242_v6 = vld [vmem:[%s771_s26] sm:$0xff]  ;;  %v243_v7 = vld [vmem:[%s771_s26 + $0x8] sm:$0xff]  ;;  %v244_v8 = vld [vmem:[%s771_s26 + $0x10] sm:$0xff]  ;;  %s307_s16 = scalar_lea.hbm %s856_s2, %s426_s21  ;;  %s309_s18 = sshll.u32 %s778_s28, 4  ;;  %s310_s18 = int_to_ptr.vmem [resolvable:$true] %s309_s18 }
  0x2a   : > { %v245_v9 = vld [vmem:[%s771_s26 + $0x18] sm:$0xff]  ;;  %v246_v10 = vld [vmem:[%s771_s26 + $0x20] sm:$0xff]  ;;  %v252_v11 = vsub.f32 %v232_v1, %v242_v6  ;;  %v253_v12 = vsub.f32 %v233_v2, %v243_v7  ;;  %v237_v13 = vld [vmem:[%s764_s7 + $0x28] sm:$0xff]  ;;  %v254_v15 = vsub.f32 %v234_v3, %v244_v8  ;;  %s311_s19 = sshll.u32 %s307_s16, 4  ;;  %s297_s12 = scalar_lea.sflag [#allocation4], %s760_s4  ;;  %s312_s19 = int_to_ptr.hbm [resolvable:$true] %s311_s19 }
  0x2b   : > { %v247_v14 = vld [vmem:[%s771_s26 + $0x28] sm:$0xff]  ;;  %v255_v16 = vsub.f32 %v235_v4, %v245_v9  ;;  %v238_v17 = vld [vmem:[%s764_s7 + $0x30] sm:$0xff]  ;;  %v256_v19 = vsub.f32 %v236_v5, %v246_v10  ;;  %v239_v25 = vld [vmem:[%s764_s7 + $0x38] sm:$0xff]  ;;  %s578_s20 = sshra.s32 %s312_s19, 4  ;;  %s584_s5 = scalar_lea.hbm %s856_s2, 16  ;;  %s579_s20 = int_to_ptr.hbm [resolvable:$true] %s578_s20 }
  0x2c   : > { %v248_v18 = vld [vmem:[%s771_s26 + $0x30] sm:$0xff]  ;;  %v262_v20 = vand.u32 2147483647, %v252_v11  ;;  %v263_v21 = vand.u32 2147483647, %v253_v12  ;;  %v257_v23 = vsub.f32 %v237_v13, %v247_v14  ;;  %v249_v26 = vld [vmem:[%s771_s26 + $0x38] sm:$0xff]  ;;  %p585_p7 = scmp.lt.s32.totalorder %s579_s20, %s856_s2 }
  0x2d   : > { %v264_v22 = vand.u32 2147483647, %v254_v15  ;;  %v265_v24 = vand.u32 2147483647, %v255_v16  ;;  %v258_v27 = vsub.f32 %v238_v17, %v248_v18  ;;  %v266_v28 = vand.u32 2147483647, %v256_v19 }
  0x2e   : > { %v273_v29 = vsel %vm230_vm0, %v262_v20, 0.0  ;;  %v274_v30 = vsel %vm230_vm0, %v263_v21, 0.0  ;;  %v240_v32 = vld [vmem:[%s764_s7 + $0x40] sm:$0xff]  ;;  %v259_v35 = vsub.f32 %v239_v25, %v249_v26  ;;  %v267_v36 = vand.u32 2147483647, %v257_v23  ;;  %v241_v38 = vld [vmem:[%s764_s7 + $0x48] sm:$0xff] }
  0x2f   : > { %v276_v31 = vsel %vm230_vm0, %v264_v22, 0.0  ;;  %v250_v33 = vld [vmem:[%s771_s26 + $0x40] sm:$0xff]  ;;  %v275_v34 = vadd.f32 %v274_v30, %v273_v29  ;;  %v278_v37 = vsel %vm230_vm0, %v265_v24, 0.0  ;;  %v251_v39 = vld [vmem:[%s771_s26 + $0x48] sm:$0xff]  ;;  %v268_v42 = vand.u32 2147483647, %v258_v27 }
  0x30   : > { %v260_v41 = vsub.f32 %v240_v32, %v250_v33  ;;  %v280_v43 = vsel %vm230_vm0, %v266_v28, 0.0  ;;  %v261_v45 = vsub.f32 %v241_v38, %v251_v39  ;;  %v269_v46 = vand.u32 2147483647, %v259_v35  ;;  %v293_v59 = vld [vmem:[%s778_s28] sm:$0xff]  ;;  %s580_s29 = scalar_lea.hbm %s579_s20, 8 }
  0x31   : > { %v277_v40 = vadd.f32 %v276_v31, %v275_v34  ;;  %v282_v47 = vsel %vm230_vm0, %v267_v36, 0.0  ;;  %v284_v50 = vsel %vm230_vm0, %v268_v42, 0.0  ;;  %p581_p4 = scmp.ne.s32.totalorder %s579_s20, %s580_s29  ;;  %p586_p8 = scmp.lt.s32.totalorder %s584_s5, %s580_s29 }
  0x32   : > { %v270_v49 = vand.u32 2147483647, %v260_v41  ;;  %v271_v52 = vand.u32 2147483647, %v261_v45  ;;  %v286_v53 = vsel %vm230_vm0, %v269_v46, 0.0 }
  0x33   : > { %v279_v44 = vadd.f32 %v278_v37, %v277_v40  ;;  %p582_p5 = pnand %p581_p4, %p721_p9  ;;  %p587_p10 = por %p586_p8, %p585_p7 }
  0x34   : > { %v288_v55 = vsel %vm230_vm0, %v270_v49, 0.0  ;;  %v290_v57 = vsel %vm230_vm0, %v271_v52, 0.0 }
  0x35   : > { %v281_v48 = vadd.f32 %v280_v43, %v279_v44  ;;  %p583_p6 = pneg %p582_p5 }
  0x37   : > { %v283_v51 = vadd.f32 %v282_v47, %v281_v48  ;;  %p588_p13 = pnand %p587_p10, %p583_p6 }
  0x39   : > { %v285_v54 = vadd.f32 %v284_v50, %v283_v51 }
  0x3b   : > { %v287_v56 = vadd.f32 %v286_v53, %v285_v54 }
  0x3d   : > { %v289_v58 = vadd.f32 %v288_v55, %v287_v56 }
  0x3f   : > { %v291_v60 = vadd.f32 %v290_v57, %v289_v58 }
  0x41   : > { %v294_v61 = vadd.f32 %v293_v59, %v291_v60 }
  0x43   : > { %295 = vst.msk [vmem:[%s778_s28] sm:$0xff] %vm230_vm0, %v294_v61 }
  0x44   : > { %591 = shalt.err (!%p588_p13)
}
  0x45   : > { %438 = dma.vmem_to_hbm [thread:$0]  (%p721_p9), %s310_s18, 128, %s312_s19, %s297_s12  }
  0x46 PF: > { %s323_s4 = sand.u32 1, %s630_s9   ;;  %p448_p0 = pnand %p420_p12, %p728_p11 }
  0x47   : > { %s324_s25 = scalar_lea.sflag [#allocation4], %s323_s4 }
  0x48   : > { %p449_p1 = pneg %p448_p0 }
  0x4a   : > { %625 = dma.done.wait (%p449_p1), %s324_s25, 128  }
  0x4b   : > { %627 = vsyncadd (%p449_p1), %s324_s25, 4294967168  ;;  %s21_s14 = sadd.s32 1, %s650_s14   ;;  %s862_s9 = smov %s634_s10 }
  0x4c   : > { %p18_p2 = scmp.ge.s32.totalorder %s21_s14, 4   ;;  %s863_s10 = smov %s638_s11 }
  0x4d   : > { %s864_s11 = smov %s726_s23  ;;  %s865_s12 = smov %s646_s13 }
  0x4e   : > { %s866_s13 = smov %s868_s17  ;;  %20 = sbr.rel (!%p18_p2) target bundleno = 8 (0x8), region = 90 }
  0x53   :  { %330 = vsyncpa [#allocation3], 1 }
  0x54   :  { %332 = vsyncpa [#allocation3 + $0x1], 1 }
  0x55   :  { %333 = vsyncpa [#allocation6], 1 }
  0x56   :  { %335 = vsyncpa [#allocation6 + $0x1], 1 }
  0x57   :  { %336 = vsyncpa [#allocation4], 1 }
  0x58   :  { %338 = vsyncpa [#allocation4 + $0x1], 1 }

</bundles_post_ra>
